<compile_context>
chip_gen: v7x
topology: tpu7x:2x2x1
jax: 0.10.0
libtpu: 0.0.40
codegen_flags: <defaults>
</compile_context>

<pallas_src>
import jax
import jax.numpy as jnp
from jax.experimental import pallas as pl
from jax.experimental.pallas import tpu as pltpu  # noqa: F401  (TPU backend)


def feat_kernel(x_ref, w1_ref, b1_ref, gamma_ref, beta_ref, w2_ref, b2_ref, o_ref):
    inv_b = 1.0 / x_ref.shape[0]                       # static Python constant

    # Linear(IE_dim, 512): bf16 operands -> f32 accumulation on the MXU.
    h = jnp.dot(x_ref[...], w1_ref[...], preferred_element_type=jnp.float32)
    h = h + b1_ref[...]                                # f32 bias add

    # BatchNorm1d(512), training-mode batch stats, single-pass reduction:
    #   mu  = E[h],  var = E[h^2] - mu^2  (biased variance, eps = 1e-5)
    sum_h = jnp.sum(h, axis=0, keepdims=True)
    sum_h2 = jnp.sum(h * h, axis=0, keepdims=True)
    mu = sum_h * inv_b
    var = sum_h2 * inv_b - mu * mu
    # Fold the BN affine into one per-column scale/shift on the [1, H] rows.
    s = gamma_ref[...] * jax.lax.rsqrt(var + 1e-5)     # [1, H]
    t = beta_ref[...] - mu * s                         # [1, H]

    # Normalize + ReLU in a single fused multiply-add + max on the [B, H] tile.
    r = jnp.maximum(h * s + t, 0.0)

    # TODO(synk): Dropout(flags['ldr']) is identity here (eval semantics; torch
    # dropout RNG has no Pallas equivalent).

    # Linear(512, 128) -> Sigmoid (bf16 operands, f32 accumulation).
    z = jnp.dot(r.astype(jnp.bfloat16), w2_ref[...],
                preferred_element_type=jnp.float32)
    z = z + b2_ref[...]
    o_ref[...] = jax.nn.sigmoid(z)


def feat_forward(x, w1, b1, gamma, beta, w2, b2):
    B, D_in = x.shape
    H = w1.shape[1]
    D_out = w2.shape[1]

    # bf16 operands for the MXU; biases / BN params stay f32.
    x_bf = x.astype(jnp.bfloat16)
    w1_bf = w1.astype(jnp.bfloat16)
    w2_bf = w2.astype(jnp.bfloat16)

    # All operands fit comfortably in VMEM (weights ~160 KB in bf16), and
    # training-mode BN couples the rows of the batch, so a single grid step
    # with whole-array blocks is the correct/fused choice at these sizes.
    # (Batch tiling + a "parallel" grid axis only becomes legal once BN is
    # switched to running stats / folded into Linear1.)
    full = lambda shape: pl.BlockSpec(shape, lambda: tuple(0 for _ in shape))

    flops = 2 * B * (D_in * H + H * D_out)             # two matmuls
    transcendentals = B * D_out + H                    # sigmoid exp + rsqrt
    bytes_accessed = (
        x_bf.size * 2 + w1_bf.size * 2 + w2_bf.size * 2
        + (b1.size + gamma.size + beta.size + b2.size) * 4
        + B * D_out * 4
    )

    return pl.pallas_call(
        feat_kernel,
        out_shape=jax.ShapeDtypeStruct((B, D_out), jnp.float32),
        in_specs=[
            full((B, D_in)),     # x       (bf16)
            full((D_in, H)),     # W1      (bf16)
            full((1, H)),        # b1      (f32)
            full((1, H)),        # gamma   (f32)
            full((1, H)),        # beta    (f32)
            full((H, D_out)),    # W2      (bf16)
            full((1, D_out)),    # b2      (f32)
        ],
        out_specs=full((B, D_out)),
        cost_estimate=pl.CostEstimate(
            flops=flops,
            transcendentals=transcendentals,
            bytes_accessed=bytes_accessed,
        ),
    )(x_bf, w1_bf, b1, gamma, beta, w2_bf, b2)


def init_params(key, d_in, hidden, d_out):
    """Deterministic synthetic parameters (PyTorch-Linear-style uniform init)."""
    k1, k2, k3, k4 = jax.random.split(key, 4)
    lim1 = 1.0 / jnp.sqrt(d_in)
    lim2 = 1.0 / jnp.sqrt(hidden)
    w1 = jax.random.uniform(k1, (d_in, hidden), jnp.float32, -lim1, lim1)
    b1 = jax.random.uniform(k2, (1, hidden), jnp.float32, -lim1, lim1)
    gamma = jnp.ones((1, hidden), jnp.float32)   # BatchNorm1d weight
    beta = jnp.zeros((1, hidden), jnp.float32)   # BatchNorm1d bias
    w2 = jax.random.uniform(k3, (hidden, d_out), jnp.float32, -lim2, lim2)
    b2 = jax.random.uniform(k4, (1, d_out), jnp.float32, -lim2, lim2)
    return w1, b1, gamma, beta, w2, b2


if __name__ == "__main__":
    # flags = {'hd': 1, 'ldr': 0.25}; X (IE_dim) = 32
    B, IE_DIM, HIDDEN, D_OUT = 8, 32, 512, 128

    key = jax.random.PRNGKey(0)
    kx, kp = jax.random.split(key)
    x = jax.random.normal(kx, (B, IE_DIM), jnp.float32)
    params = init_params(kp, IE_DIM, HIDDEN, D_OUT)

    out = feat_forward(x, *params)
    jax.block_until_ready(out)

    # Sanity check against a pure-f32 JAX reference of the same forward pass.
    # Tolerance is loosened to account for bf16 MXU operands in the kernel.
    w1, b1, gamma, beta, w2, b2 = params
    h = x @ w1 + b1
    mu = h.mean(0, keepdims=True)
    var = ((h - mu) ** 2).mean(0, keepdims=True)
    r = jnp.maximum((h - mu) / jnp.sqrt(var + 1e-5) * gamma + beta, 0.0)
    ref = jax.nn.sigmoid(r @ w2 + b2)
    assert out.shape == (B, D_OUT)
    assert jnp.allclose(out, ref, atol=3e-2, rtol=3e-2), (
        float(jnp.max(jnp.abs(out - ref))))

    print("KERNEL_OK")
</pallas_src>

<mosaic_0001>
module attributes {stable_mosaic.version = 11 : i64} {
  func.func @feat_kernel(%arg0: memref<8x32xbf16, #tpu.memory_space<vmem>>, %arg1: memref<32x512xbf16, #tpu.memory_space<vmem>>, %arg2: memref<1x512xf32, #tpu.memory_space<vmem>>, %arg3: memref<1x512xf32, #tpu.memory_space<vmem>>, %arg4: memref<1x512xf32, #tpu.memory_space<vmem>>, %arg5: memref<512x128xbf16, #tpu.memory_space<vmem>>, %arg6: memref<1x128xf32, #tpu.memory_space<vmem>>, %arg7: memref<8x128xf32, #tpu.memory_space<vmem>>) attributes {dimension_semantics = [], scalar_prefetch = 0 : i64, scratch_operands = 0 : i64, tpu.core_type = #tpu.core_type<tc>} {
    %c0 = arith.constant 0 : index
    %c0_0 = arith.constant 0 : index
    %0 = vector.load %arg0[%c0, %c0_0] : memref<8x32xbf16, #tpu.memory_space<vmem>>, vector<8x32xbf16>
    %c0_1 = arith.constant 0 : index
    %c0_2 = arith.constant 0 : index
    %1 = vector.load %arg1[%c0_1, %c0_2] : memref<32x512xbf16, #tpu.memory_space<vmem>>, vector<32x512xbf16>
    %cst = arith.constant dense<0.000000e+00> : vector<8x512xf32>
    %2 = tpu.matmul %0, %1, %cst {dimension_numbers = #tpu.dot_dimension_numbers<[1], [0], [0], [1], [0, 0, 1, 1], [], []>} : vector<8x32xbf16>, vector<32x512xbf16>, vector<8x512xf32> -> vector<8x512xf32>
    %c0_3 = arith.constant 0 : index
    %c0_4 = arith.constant 0 : index
    %3 = vector.load %arg2[%c0_3, %c0_4] : memref<1x512xf32, #tpu.memory_space<vmem>>, vector<1x512xf32>
    %4 = vector.broadcast %3 : vector<1x512xf32> to vector<8x512xf32>
    %5 = arith.addf %2, %4 : vector<8x512xf32>
    %cst_5 = arith.constant dense<0.000000e+00> : vector<512xf32>
    %6 = vector.multi_reduction <add>, %5, %cst_5 [0] : vector<8x512xf32> to vector<512xf32>
    %7 = vector.shape_cast %6 : vector<512xf32> to vector<1x512xf32>
    %8 = arith.mulf %5, %5 : vector<8x512xf32>
    %cst_6 = arith.constant dense<0.000000e+00> : vector<512xf32>
    %9 = vector.multi_reduction <add>, %8, %cst_6 [0] : vector<8x512xf32> to vector<512xf32>
    %10 = vector.shape_cast %9 : vector<512xf32> to vector<1x512xf32>
    %cst_7 = arith.constant 1.250000e-01 : f32
    %11 = vector.broadcast %cst_7 : f32 to vector<1x512xf32>
    %12 = arith.mulf %7, %11 : vector<1x512xf32>
    %cst_8 = arith.constant 1.250000e-01 : f32
    %13 = vector.broadcast %cst_8 : f32 to vector<1x512xf32>
    %14 = arith.mulf %10, %13 : vector<1x512xf32>
    %15 = arith.mulf %12, %12 : vector<1x512xf32>
    %16 = arith.subf %14, %15 : vector<1x512xf32>
    %c0_9 = arith.constant 0 : index
    %c0_10 = arith.constant 0 : index
    %17 = vector.load %arg3[%c0_9, %c0_10] : memref<1x512xf32, #tpu.memory_space<vmem>>, vector<1x512xf32>
    %cst_11 = arith.constant 9.99999974E-6 : f32
    %18 = vector.broadcast %cst_11 : f32 to vector<1x512xf32>
    %19 = arith.addf %16, %18 : vector<1x512xf32>
    %20 = math.rsqrt %19 : vector<1x512xf32>
    %21 = arith.mulf %17, %20 : vector<1x512xf32>
    %c0_12 = arith.constant 0 : index
    %c0_13 = arith.constant 0 : index
    %22 = vector.load %arg4[%c0_12, %c0_13] : memref<1x512xf32, #tpu.memory_space<vmem>>, vector<1x512xf32>
    %23 = arith.mulf %12, %21 : vector<1x512xf32>
    %24 = arith.subf %22, %23 : vector<1x512xf32>
    %25 = vector.broadcast %21 : vector<1x512xf32> to vector<8x512xf32>
    %26 = arith.mulf %5, %25 : vector<8x512xf32>
    %27 = vector.broadcast %24 : vector<1x512xf32> to vector<8x512xf32>
    %28 = arith.addf %26, %27 : vector<8x512xf32>
    %cst_14 = arith.constant 0.000000e+00 : f32
    %29 = vector.broadcast %cst_14 : f32 to vector<8x512xf32>
    %30 = arith.maximumf %28, %29 : vector<8x512xf32>
    %31 = arith.truncf %30 : vector<8x512xf32> to vector<8x512xbf16>
    %c0_15 = arith.constant 0 : index
    %c0_16 = arith.constant 0 : index
    %32 = vector.load %arg5[%c0_15, %c0_16] : memref<512x128xbf16, #tpu.memory_space<vmem>>, vector<512x128xbf16>
    %cst_17 = arith.constant dense<0.000000e+00> : vector<8x128xf32>
    %33 = tpu.matmul %31, %32, %cst_17 {dimension_numbers = #tpu.dot_dimension_numbers<[1], [0], [0], [1], [0, 0, 1, 1], [], []>} : vector<8x512xbf16>, vector<512x128xbf16>, vector<8x128xf32> -> vector<8x128xf32>
    %c0_18 = arith.constant 0 : index
    %c0_19 = arith.constant 0 : index
    %34 = vector.load %arg6[%c0_18, %c0_19] : memref<1x128xf32, #tpu.memory_space<vmem>>, vector<1x128xf32>
    %35 = vector.broadcast %34 : vector<1x128xf32> to vector<8x128xf32>
    %36 = arith.addf %33, %35 : vector<8x128xf32>
    %37 = arith.negf %36 : vector<8x128xf32>
    %38 = math.exp %37 : vector<8x128xf32>
    %cst_20 = arith.constant 1.000000e+00 : f32
    %39 = vector.broadcast %cst_20 : f32 to vector<8x128xf32>
    %40 = arith.addf %39, %38 : vector<8x128xf32>
    %41 = arith.divf %39, %40 : vector<8x128xf32>
    %c0_21 = arith.constant 0 : index
    %c0_22 = arith.constant 0 : index
    %42 = vector.load %arg7[%c0_21, %c0_22] : memref<8x128xf32, #tpu.memory_space<vmem>>, vector<8x128xf32>
    tpu.vector_store %arg7[%c0_21, %c0_22], %41 {strides = array<i32>} : memref<8x128xf32, #tpu.memory_space<vmem>>, vector<8x128xf32>,
    return
  }
}

</mosaic_0001>

<bundles_post_ra>
// kernel: tpu_custom_call.1
= control target key start
LH: loop header
LB: loop body
LE: loop exit
PB: predicated region body
PF: predicated region fallthrough
CT: control target
= control target key end

     0   :  { %12 = vsyncpa [#allocation3], 0  ;;  %s1203_s0 = inlined_call_operand.hbm [shape: bf16[8,32], index: 0, kind: input, shape index: {}]   ;;  %s1204_s1 = inlined_call_operand.hbm [shape: bf16[32,512], index: 1, kind: input, shape index: {}]   ;;  %s1205_s2 = inlined_call_operand.vmem [shape: f32[1,512], index: 2, kind: input, shape index: {}]   ;;  %s1206_s3 = inlined_call_operand.vmem [shape: f32[1,512], index: 3, kind: input, shape index: {}]   ;;  %s1207_s4 = inlined_call_operand.vmem [shape: f32[1,512], index: 4, kind: input, shape index: {}]   ;;  %s1208_s5 = inlined_call_operand.hbm [shape: bf16[512,128], index: 5, kind: input, shape index: {}]   ;;  %s1209_s6 = inlined_call_operand.vmem [shape: f32[1,128], index: 6, kind: input, shape index: {}]   ;;  %s1210_s7 = inlined_call_operand.hbm [shape: f32[8,128], index: 7, kind: output, shape index: {}]  }
   0x1   :  { %13 = vsyncpa [#allocation6], 0 }
   0x2   :  { %14 = vsyncpa [#allocation4], 0  ;;  %s1038_s24 = smov [#allocation5]   ;;  %s944_s28 = scalar_lea.hbm %s1204_s1, 1024 }
   0x3   :  { %s30_s25 = sshll.u32 %s1038_s24, 4  ;;  %p945_p0 = scmp.ne.s32.totalorder %s1204_s1, %s944_s28  ;;  %s31_s25 = int_to_ptr.vmem [resolvable:$true] %s30_s25 }
   0x4   :  { %p948_p1 = scmp.lt.u32.totalorder %s944_s28, %s1204_s1 }
   0x6   :  { %p950_p2 = pnand %p948_p1, %p945_p0 }
   0x8   :  { %953 = shalt.err (!%p950_p2)
}
   0x9   :  { %s954_s10 = scalar_lea.vmem %s31_s25, 1024  ;;  %p959_p4 = scmp.lt.s32.totalorder %s31_s25, %s31_s25 }
   0xa   :  { %p955_p3 = scmp.ne.s32.totalorder %s31_s25, %s954_s10  ;;  %p960_p5 = scmp.lt.s32.totalorder %s954_s10, %s954_s10 }
   0xc   :  { %p961_p6 = por %p960_p5, %p959_p4 }
   0xe   :  { %p962_p7 = pnand %p961_p6, %p955_p3 }
  0x10   :  { %965 = shalt.err (!%p962_p7)
}
  0x11   :  { %s1039_s11 = smov 256   ;;  %s1040_s12 = smov 16  }
  0x12   :  { %36 = dma.hbm_to_vmem [thread:$0]  %s1204_s1, 1024, %s31_s25, [#allocation6], %s1039_s11, %s1039_s11, %s1040_s12  }
  0x13   :  { %s1041_s15 = smov [#allocation2]   ;;  %s1042_s17 = smov [#allocation7]  }
  0x14   :  { %s21_s16 = sshll.u32 %s1041_s15, 4  ;;  %s48_s18 = sshll.u32 %s1042_s17, 4  ;;  %s22_s16 = int_to_ptr.vmem [resolvable:$true] %s21_s16  ;;  %s49_s18 = int_to_ptr.vmem [resolvable:$true] %s48_s18 }
  0x15   :  { %s966_s21 = scalar_lea.hbm %s1203_s0, 64 }
  0x16   :  { %p967_p8 = scmp.ne.s32.totalorder %s1203_s0, %s966_s21  ;;  %p970_p9 = scmp.lt.u32.totalorder %s966_s21, %s1203_s0 }
  0x18   :  { %p972_p10 = pnand %p970_p9, %p967_p8 }
  0x1a   :  { %975 = shalt.err (!%p972_p10)
}
  0x1b   :  { %s976_s1 = scalar_lea.vmem %s22_s16, 64  ;;  %p981_p12 = scmp.lt.s32.totalorder %s22_s16, %s22_s16 }
  0x1c   :  { %p977_p11 = scmp.ne.s32.totalorder %s22_s16, %s976_s1  ;;  %p982_p13 = scmp.lt.s32.totalorder %s976_s1, %s976_s1 }
  0x1e   :  { %p983_p0 = por %p982_p13, %p981_p12 }
  0x20   :  { %p984_p1 = pnand %p983_p0, %p977_p11 }
  0x22   :  { %987 = shalt.err (!%p984_p1)
}
  0x23   :  { %24 = dma.hbm_to_vmem [thread:$0]  %s1203_s0, 64, %s22_s16, [#allocation3]  }
  0x24   :  { %s988_s30 = scalar_lea.hbm %s1208_s5, 4096 }
  0x25   :  { %p989_p2 = scmp.ne.s32.totalorder %s1208_s5, %s988_s30  ;;  %p992_p3 = scmp.lt.u32.totalorder %s988_s30, %s1208_s5 }
  0x27   :  { %p994_p4 = pnand %p992_p3, %p989_p2 }
  0x29   :  { %997 = shalt.err (!%p994_p4)
}
  0x2a   :  { %s998_s12 = scalar_lea.vmem %s49_s18, 4096  ;;  %p1003_p6 = scmp.lt.s32.totalorder %s49_s18, %s49_s18 }
  0x2b   :  { %p999_p5 = scmp.ne.s32.totalorder %s49_s18, %s998_s12  ;;  %p1004_p7 = scmp.lt.s32.totalorder %s998_s12, %s998_s12 }
  0x2d   :  { %p1005_p8 = por %p1004_p7, %p1003_p6 }
  0x2f   :  { %p1006_p9 = pnand %p1005_p8, %p999_p5 }
  0x31   :  { %1009 = shalt.err (!%p1006_p9)
}
  0x32   :  { %s1043_s0 = smov 64   ;;  %s1044_s13 = smov 4  }
  0x33   :  { %54 = dma.hbm_to_vmem [thread:$0]  %s1208_s5, 4096, %s49_s18, [#allocation6], %s1043_s0, %s1043_s0, %s1044_s13  }
  0x34   :  { %1032 = dma.done.wait [#allocation3], 64  }
  0x35   :  { %1033 = vsyncadd [#allocation3], 4294967232 }
  0x36   :  { %1034 = dma.done.wait [#allocation6], 5120  }
  0x37   :  { %1035 = vsyncadd [#allocation6], 4294962176  ;;  %v1045_v0 = vmov 0   ;;  %v888_v1 = vld [vmem:[#allocation5 + $0x4] ss:$16 sps:$4 sm:$0xff]   ;;  %vm138_vm0 = vcmask 261120   ;;  %v78_v42 = vlaneseq }
  0x38   :  { %174 = vmatprep.mubr.bf16.mxu0 %v1045_v0  ;;  %215 = vmatprep.mubr.bf16.mxu1 %v1045_v0  ;;  %v890_v2 = vld [vmem:[#allocation5 + $0xc] ss:$16 sps:$4 sm:$0xff]   ;;  %v892_v3 = vld [vmem:[#allocation5] ss:$16 sps:$4 sm:$0xff]   ;;  %v893_v4 = vld [vmem:[#allocation5 + $0x8] ss:$16 sps:$4 sm:$0xff]  }
  0x39   :  { %142 = vmatprep.subr.bf16.mxu0 %v888_v1  ;;  %183 = vmatprep.subr.bf16.mxu1 %v890_v2  ;;  %v894_v5 = vld [vmem:[#allocation5 + $0x24] ss:$16 sps:$4 sm:$0xff]   ;;  %v896_v6 = vld [vmem:[#allocation5 + $0x2c] ss:$16 sps:$4 sm:$0xff]   ;;  %v898_v7 = vld [vmem:[#allocation5 + $0x20] ss:$16 sps:$4 sm:$0xff]  }
  0x3a   :  { %143 = vmatpush1.bf16.msra.mxu0 %v892_v3  ;;  %184 = vmatpush1.bf16.msra.mxu1 %v893_v4  ;;  %v899_v8 = vld [vmem:[#allocation5 + $0x28] ss:$16 sps:$4 sm:$0xff]   ;;  %v67_v9 = vld [vmem:[#allocation2] sm:$0xf]  ;;  %v900_v10 = vld [vmem:[#allocation7 + $0x40] sm:$0xff]   ;;  %v1124_v43 = vshrl.u32 %v78_v42, 7 }
  0x3b   :  { %144 = vmatprep.subr.bf16.mxu0 %v894_v5  ;;  %185 = vmatprep.subr.bf16.mxu1 %v896_v6  ;;  %v901_v11 = vld [vmem:[#allocation7 + $0xc0] sm:$0xff]   ;;  %v904_v14 = vld [vmem:[#allocation7 + $0x48] sm:$0xff]   ;;  %v908_v18 = vld [vmem:[#allocation7 + $0x50] sm:$0xff]   ;;  %s1047_s20 = smov [#allocation8]  }
  0x3c   :  { %v902_v12 = vld [vmem:[#allocation7] sm:$0xff]   ;;  %v905_v15 = vld [vmem:[#allocation7 + $0xc8] sm:$0xff]   ;;  %v909_v19 = vld [vmem:[#allocation7 + $0xd0] sm:$0xff]   ;;  %v1127_v44 = vsub.s32 0, %v1124_v43  ;;  %v1130_v45 = vsub.s32 2, %v1124_v43  ;;  %v1136_v47 = vsub.s32 1, %v1124_v43 }
  0x3d   :  { %v903_v13 = vld [vmem:[#allocation7 + $0x80] sm:$0xff]   ;;  %v906_v16 = vld [vmem:[#allocation7 + $0x8] sm:$0xff]   ;;  %v910_v20 = vld [vmem:[#allocation7 + $0x10] sm:$0xff]   ;;  %v1139_v48 = vsub.s32 3, %v1124_v43  ;;  %s780_s21 = sshll.u32 %s1047_s20, 4  ;;  %s781_s21 = int_to_ptr.vmem [resolvable:$true] %s780_s21 }
  0x3e   :  { %145 = vmatpush1.bf16.msra.mxu0 %v898_v7  ;;  %186 = vmatpush1.bf16.msra.mxu1 %v899_v8  ;;  %v907_v17 = vld [vmem:[#allocation7 + $0x88] sm:$0xff]   ;;  %v911_v21 = vld [vmem:[#allocation7 + $0x90] sm:$0xff]   ;;  %v912_v22 = vld [vmem:[#allocation7 + $0x58] sm:$0xff]   ;;  %p1015_p11 = scmp.lt.s32.totalorder %s781_s21, %s781_s21 }
  0x3f   :  { %834 = vmatprep.subr.bf16.mxu0 %v900_v10  ;;  %856 = vmatprep.subr.bf16.mxu1 %v901_v11  ;;  %v913_v23 = vld [vmem:[#allocation7 + $0xd8] sm:$0xff]   ;;  %v916_v26 = vld [vmem:[#allocation7 + $0x60] sm:$0xff]   ;;  %v920_v30 = vld [vmem:[#allocation7 + $0x68] sm:$0xff]  }
  0x40   :  { %v914_v24 = vld [vmem:[#allocation7 + $0x18] sm:$0xff]   ;;  %v917_v27 = vld [vmem:[#allocation7 + $0xe0] sm:$0xff]   ;;  %v921_v31 = vld [vmem:[#allocation7 + $0xe8] sm:$0xff]  }
  0x41   :  { %798 = vmatmul.mubr.msk.bf16.vlgmr.msra.gmra.mrb[0].mxu0 %vm138_vm0, %v67_v9  ;;  %799 = vmatmul.mubr.msk.bf16.vlgmr.msra.gmra.mrb[0].mxu1 %vm138_vm0, %v67_v9  ;;  %v915_v25 = vld [vmem:[#allocation7 + $0x98] sm:$0xff]   ;;  %v918_v28 = vld [vmem:[#allocation7 + $0x20] sm:$0xff]   ;;  %v922_v32 = vld [vmem:[#allocation7 + $0x28] sm:$0xff]  }
  0x42   :  { %835 = vmatpush3.bf16.msra.mxu0 %v902_v12  ;;  %857 = vmatpush3.bf16.msra.mxu1 %v903_v13  ;;  %v919_v29 = vld [vmem:[#allocation7 + $0xa0] sm:$0xff]   ;;  %v923_v33 = vld [vmem:[#allocation7 + $0xa8] sm:$0xff]   ;;  %v924_v34 = vld [vmem:[#allocation7 + $0x70] sm:$0xff]  }
  0x43   :  { %836 = vmatprep.subr.bf16.mxu0 %v904_v14  ;;  %858 = vmatprep.subr.bf16.mxu1 %v905_v15  ;;  %v925_v35 = vld [vmem:[#allocation7 + $0xf0] sm:$0xff]   ;;  %v928_v38 = vld [vmem:[#allocation7 + $0x78] sm:$0xff]  }
  0x44   :  { %v926_v36 = vld [vmem:[#allocation7 + $0x30] sm:$0xff]   ;;  %v929_v39 = vld [vmem:[#allocation7 + $0xf8] sm:$0xff]  }
  0x45   :  { %v927_v37 = vld [vmem:[#allocation7 + $0xb0] sm:$0xff]   ;;  %v930_v40 = vld [vmem:[#allocation7 + $0x38] sm:$0xff]  }
  0x46   :  { %837 = vmatpush3.bf16.msra.mxu0 %v906_v16  ;;  %859 = vmatpush3.bf16.msra.mxu1 %v907_v17  ;;  %v931_v41 = vld [vmem:[#allocation7 + $0xb8] sm:$0xff]  }
  0x47   :  { %838 = vmatprep.subr.bf16.mxu0 %v908_v18  ;;  %860 = vmatprep.subr.bf16.mxu1 %v909_v19  ;;  %v76_v46 = vld [vmem:[%s1205_s2] sm:$0xf] }
  0x48   :  { %v81_v49 = vrot.slane %v76_v46, %v1127_v44  ;;  %v89_v50 = vrot.slane %v76_v46, %v1130_v45  ;;  %v85_v51 = vrot.slane %v76_v46, %v1136_v47  ;;  %v93_v52 = vrot.slane %v76_v46, %v1139_v48 }
  0x4a   :  { %839 = vmatpush3.bf16.msra.mxu0 %v910_v20  ;;  %861 = vmatpush3.bf16.msra.mxu1 %v911_v21 }
  0x4b   :  { %840 = vmatprep.subr.bf16.mxu0 %v912_v22  ;;  %862 = vmatprep.subr.bf16.mxu1 %v913_v23 }
  0x4e   :  { %841 = vmatpush3.bf16.msra.mxu0 %v914_v24  ;;  %863 = vmatpush3.bf16.msra.mxu1 %v915_v25 }
  0x4f   :  { %842 = vmatprep.subr.bf16.mxu0 %v916_v26  ;;  %864 = vmatprep.subr.bf16.mxu1 %v917_v27 }
  0x52   :  { %843 = vmatpush3.bf16.msra.mxu0 %v918_v28  ;;  %865 = vmatpush3.bf16.msra.mxu1 %v919_v29 }
  0x53   :  { %844 = vmatprep.subr.bf16.mxu0 %v920_v30  ;;  %866 = vmatprep.subr.bf16.mxu1 %v921_v31 }
  0x56   :  { %845 = vmatpush3.bf16.msra.mxu0 %v922_v32  ;;  %867 = vmatpush3.bf16.msra.mxu1 %v923_v33 }
  0x57   :  { %846 = vmatprep.subr.bf16.mxu0 %v924_v34  ;;  %868 = vmatprep.subr.bf16.mxu1 %v925_v35 }
  0x5a   :  { %847 = vmatpush3.bf16.msra.mxu0 %v926_v36  ;;  %869 = vmatpush3.bf16.msra.mxu1 %v927_v37 }
  0x5b   :  { %848 = vmatprep.subr.bf16.mxu0 %v928_v38  ;;  %870 = vmatprep.subr.bf16.mxu1 %v929_v39 }
  0x5e   :  { %849 = vmatpush3.bf16.msra.mxu0 %v930_v40  ;;  %871 = vmatpush3.bf16.msra.mxu1 %v931_v41 }
 0x114   :  { %v176_v53 = vpop.f32.mrb[0].mxu0  ;;  %v217_v54 = vpop.f32.mrb[0].mxu1 }
 0x115   :  { %v1145_v55 = vadd.f32 %v176_v53, %v81_v49  ;;  %v1147_v56 = vadd.f32 %v217_v54, %v89_v50  ;;  %v178_v57 = vpop.f32.mrb[1].mxu0  ;;  %v219_v58 = vpop.f32.mrb[1].mxu1 }
 0x116   :  { %v1149_v59 = vadd.f32 %v178_v57, %v85_v51  ;;  %v1151_v60 = vadd.f32 %v219_v58, %v93_v52  ;;  %v180_v61 = vpop.f32.mrb[2].mxu0  ;;  %v221_v62 = vpop.f32.mrb[2].mxu1 }
 0x117   :  { %v224_v63 = vrot.slane %v1145_v55, 4  ;;  %v248_v0 = vmul.f32 %v1145_v55, %v1145_v55  ;;  %v236_v1 = vrot.slane %v1147_v56, 4  ;;  %v250_v2 = vmul.f32 %v1147_v56, %v1147_v56  ;;  %v181_v3 = vpop.f32.mrb[3].mxu0  ;;  %v222_v4 = vpop.f32.mrb[3].mxu1 }
 0x118   :  { %v230_v5 = vrot.slane %v1149_v59, 4  ;;  %v249_v6 = vmul.f32 %v1149_v59, %v1149_v59  ;;  %v242_v7 = vrot.slane %v1151_v60, 4  ;;  %v251_v8 = vmul.f32 %v1151_v60, %v1151_v60 }
 0x119   :  { %v225_v9 = vadd.f32 %v224_v63, %v1145_v55  ;;  %v252_v10 = vrot.slane %v248_v0, 4  ;;  %v237_v11 = vadd.f32 %v236_v1, %v1147_v56  ;;  %v264_v12 = vrot.slane %v250_v2, 4 }
 0x11a   :  { %v231_v13 = vadd.f32 %v230_v5, %v1149_v59  ;;  %v258_v14 = vrot.slane %v249_v6, 4  ;;  %v243_v15 = vadd.f32 %v242_v7, %v1151_v60  ;;  %v270_v16 = vrot.slane %v251_v8, 4 }
 0x11b   :  { %v226_v17 = vrot.slane %v225_v9, 2  ;;  %v253_v18 = vadd.f32 %v252_v10, %v248_v0  ;;  %v238_v19 = vrot.slane %v237_v11, 2  ;;  %v265_v20 = vadd.f32 %v264_v12, %v250_v2 }
 0x11c   :  { %v232_v21 = vrot.slane %v231_v13, 2  ;;  %v259_v22 = vadd.f32 %v258_v14, %v249_v6  ;;  %v244_v23 = vrot.slane %v243_v15, 2  ;;  %v271_v24 = vadd.f32 %v270_v16, %v251_v8 }
 0x11d   :  { %v227_v25 = vadd.f32 %v226_v17, %v225_v9  ;;  %v254_v26 = vrot.slane %v253_v18, 2  ;;  %v239_v27 = vadd.f32 %v238_v19, %v237_v11  ;;  %v266_v28 = vrot.slane %v265_v20, 2 }
 0x11e   :  { %v233_v29 = vadd.f32 %v232_v21, %v231_v13  ;;  %v260_v30 = vrot.slane %v259_v22, 2  ;;  %v245_v31 = vadd.f32 %v244_v23, %v243_v15  ;;  %v272_v32 = vrot.slane %v271_v24, 2 }
 0x11f   :  { %v228_v33 = vrot.slane %v227_v25, 1  ;;  %v255_v34 = vadd.f32 %v254_v26, %v253_v18  ;;  %v240_v35 = vrot.slane %v239_v27, 1  ;;  %v267_v36 = vadd.f32 %v266_v28, %v265_v20 }
 0x120   :  { %v234_v37 = vrot.slane %v233_v29, 1  ;;  %v261_v38 = vadd.f32 %v260_v30, %v259_v22  ;;  %v246_v39 = vrot.slane %v245_v31, 1  ;;  %v273_v40 = vadd.f32 %v272_v32, %v271_v24 }
 0x121   :  { %v229_v41 = vadd.f32 %v228_v33, %v227_v25  ;;  %v256_v42 = vrot.slane %v255_v34, 1  ;;  %v241_v46 = vadd.f32 %v240_v35, %v239_v27  ;;  %v268_v49 = vrot.slane %v267_v36, 1 }
 0x122   :  { %v235_v50 = vadd.f32 %v234_v37, %v233_v29  ;;  %v262_v51 = vrot.slane %v261_v38, 1  ;;  %v247_v52 = vadd.f32 %v246_v39, %v245_v31  ;;  %v274_v53 = vrot.slane %v273_v40, 1  ;;  %v292_v31 = vld [vmem:[%s1206_s3] sm:$0xf] }
 0x123   :  { %v257_v54 = vadd.f32 %v256_v42, %v255_v34  ;;  %v276_v57 = vmul.f32 0.125, %v229_v41  ;;  %v269_v58 = vadd.f32 %v268_v49, %v267_v36  ;;  %v278_v61 = vmul.f32 0.125, %v241_v46 }
 0x124   :  { %v263_v62 = vadd.f32 %v262_v51, %v261_v38  ;;  %v277_v63 = vmul.f32 0.125, %v235_v50  ;;  %v275_v0 = vadd.f32 %v274_v53, %v273_v40  ;;  %v279_v1 = vmul.f32 0.125, %v247_v52 }
 0x125   :  { %v280_v2 = vmul.f32 0.125, %v257_v54  ;;  %v284_v3 = vmul.f32 %v276_v57, %v276_v57  ;;  %v282_v4 = vmul.f32 0.125, %v269_v58  ;;  %v286_v5 = vmul.f32 %v278_v61, %v278_v61  ;;  %v331_v58 = vld [vmem:[%s1207_s4] sm:$0xf] }
 0x126   :  { %v281_v6 = vmul.f32 0.125, %v263_v62  ;;  %v285_v7 = vmul.f32 %v277_v63, %v277_v63  ;;  %v283_v8 = vmul.f32 0.125, %v275_v0  ;;  %v287_v9 = vmul.f32 %v279_v1, %v279_v1 }
 0x127   :  { %v288_v10 = vsub.f32 %v280_v2, %v284_v3  ;;  %v290_v11 = vsub.f32 %v282_v4, %v286_v5  ;;  %v1046_v18 = vmov 1966171168  }
 0x128   :  { %v289_v12 = vsub.f32 %v281_v6, %v285_v7  ;;  %v291_v13 = vsub.f32 %v283_v8, %v287_v9  ;;  %v308_v19 = vunpack.c.l.s4 %v1046_v18 }
 0x129   :  { %v293_v14 = vadd.f32 1e-05, %v288_v10  ;;  %v295_v15 = vadd.f32 1e-05, %v290_v11 }
 0x12a   :  { %v294_v16 = vadd.f32 1e-05, %v289_v12  ;;  %v296_v17 = vadd.f32 1e-05, %v291_v13  ;;  %v309_v20 = vunpack.c.0.s8 %v308_v19 }
 0x12b   :  { %932 = vrsqrt.f32 %v293_v14 }
 0x12c   :  { %934 = vrsqrt.f32 %v295_v15  ;;  %v312_v23 = vsub.s32 %v309_v20, %v1124_v43 }
 0x12d   :  { %936 = vrsqrt.f32 %v294_v16 }
 0x12e   :  { %938 = vrsqrt.f32 %v296_v17 }
 0x135   :  { %v933_v21 = vpop.eup %932 }
 0x136   :  { %v935_v22 = vpop.eup %934 }
 0x137   :  { %v937_v24 = vpop.eup %936 }
 0x138   :  { %v939_v25 = vpop.eup %938  ;;  %v305_v26 = vcombine.low %v933_v21, %v937_v24 }
 0x139   :  { %v306_v27 = vcombine.low %v935_v22, %v939_v25 }
 0x13a   :  { %v313_v28 = vrot.slane %v305_v26, %v312_v23 }
 0x13b   :  { %v320_v29 = vrot.slane %v306_v27, %v312_v23 }
 0x13d   :  { %v321_v30 = vcombine.low %v313_v28, %v320_v29 }
 0x13f   :  { %v328_v32 = vrot.slane %v321_v30, %v312_v23 }
 0x141   :  { %v330_v33 = vmul.f32 %v328_v32, %v292_v31 }
 0x143   :  { %v344_v34 = vrot.slane %v330_v33, %v1130_v45  ;;  %v348_v35 = vrot.slane %v330_v33, %v1139_v48  ;;  %v336_v36 = vrot.slane %v330_v33, %v1127_v44  ;;  %v340_v43 = vrot.slane %v330_v33, %v1136_v47 }
 0x145   :  { %v355_v37 = vmul.f32 %v344_v34, %v278_v61  ;;  %v356_v38 = vmul.f32 %v348_v35, %v279_v1  ;;  %v353_v39 = vmul.f32 %v336_v36, %v276_v57  ;;  %v354_v40 = vmul.f32 %v340_v43, %v277_v63 }
 0x146   :  { %v388_v41 = vmul.f32 %v340_v43, %v1149_v59  ;;  %v390_v42 = vmul.f32 %v348_v35, %v1151_v60  ;;  %v387_v46 = vmul.f32 %v336_v36, %v1145_v55  ;;  %v389_v49 = vmul.f32 %v344_v34, %v1147_v56 }
 0x147   :  { %v362_v50 = vcombine.low %v355_v37, %v356_v38  ;;  %v361_v51 = vcombine.low %v353_v39, %v354_v40 }
 0x149   :  { %v376_v52 = vrot.slane %v362_v50, %v312_v23  ;;  %v369_v53 = vrot.slane %v361_v51, %v312_v23 }
 0x14b   :  { %v377_v54 = vcombine.low %v369_v53, %v376_v52 }
 0x14d   :  { %v384_v61 = vrot.slane %v377_v54, %v312_v23 }
 0x14f   :  { %v386_v57 = vsub.f32 %v331_v58, %v384_v61 }
 0x151   :  { %v399_v62 = vrot.slane %v386_v57, %v1136_v47  ;;  %v407_v59 = vrot.slane %v386_v57, %v1139_v48  ;;  %v395_v60 = vrot.slane %v386_v57, %v1127_v44  ;;  %v403_v55 = vrot.slane %v386_v57, %v1130_v45  ;;  %v800_v45 = vld [vmem:[%s1209_s6] ss:$0 sm:$0xff]  ;;  %s1010_s6 = scalar_lea.vmem %s781_s21, 128 }
 0x152   :  { %p1011_p10 = scmp.ne.s32.totalorder %s781_s21, %s1010_s6  ;;  %p1016_p12 = scmp.lt.s32.totalorder %s1010_s6, %s1010_s6 }
 0x153   :  { %v413_v56 = vadd.f32 %v399_v62, %v388_v41  ;;  %v415_v63 = vadd.f32 %v407_v59, %v390_v42  ;;  %v412_v0 = vadd.f32 %v395_v60, %v387_v46  ;;  %v414_v1 = vadd.f32 %v403_v55, %v389_v49 }
 0x154   :  { %p1017_p13 = por %p1016_p12, %p1015_p11 }
 0x155   :  { %v417_v2 = vmax.f32 %v413_v56, 0.0  ;;  %v419_v3 = vmax.f32 %v415_v63, 0.0  ;;  %v416_v4 = vmax.f32 %v412_v0, 0.0  ;;  %v418_v5 = vmax.f32 %v414_v1, 0.0 }
 0x156   :  { %p1018_p0 = pnand %p1017_p13, %p1011_p10 }
 0x157   :  { %v421_v6 = vpack.c.bf16 %v417_v2, %v417_v2  ;;  %v423_v7 = vpack.c.bf16 %v419_v3, %v419_v3  ;;  %v420_v8 = vpack.c.bf16 %v416_v4, %v416_v4  ;;  %v422_v9 = vpack.c.bf16 %v418_v5, %v418_v5 }
 0x159   :  { %719 = vmatprep.mubr.bf16.mxu0 %v421_v6  ;;  %759 = vmatprep.mubr.bf16.mxu1 %v423_v7 }
 0x15a   :  { %720 = vmatmul.mubr.bf16.vlgmr.msra.gmra.mrb[4].mxu0 %v420_v8  ;;  %760 = vmatmul.mubr.bf16.vlgmr.msra.gmra.mrb[4].mxu1 %v422_v9 }
 0x22d   :  { %v850_v47 = vpop.f32.mrb[4].mxu0  ;;  %v872_v44 = vpop.f32.mrb[4].mxu1 }
 0x22e   :  { %v851_v48 = vpop.f32.mrb[5].mxu0  ;;  %v873_v10 = vpop.f32.mrb[5].mxu1 }
 0x22f   :  { %v852_v11 = vadd.f32 %v851_v48, %v850_v47  ;;  %v874_v12 = vadd.f32 %v873_v10, %v872_v44  ;;  %v853_v13 = vpop.f32.mrb[6].mxu0  ;;  %v875_v14 = vpop.f32.mrb[6].mxu1 }
 0x230   :  { %v854_v15 = vpop.f32.mrb[7].mxu0  ;;  %v876_v16 = vpop.f32.mrb[7].mxu1 }
 0x231   :  { %v722_v17 = vadd.f32 %v852_v11, %v800_v45 }
 0x233   :  { %v762_v18 = vadd.f32 %v874_v12, %v722_v17 }
 0x235   :  { %v833_v19 = vmul.f32 -1.442695, %v762_v18 }
 0x237   :  { %940 = vpow2.f32 %v833_v19 }
 0x241   :  { %v941_v20 = vpop.eup %940 }
 0x242   :  { %v770_v21 = vadd.f32 1.0, %v941_v20 }
 0x244   :  { %942 = vrcp.f32 %v770_v21 }
 0x24e   :  { %v943_v22 = vpop.eup %942 }
 0x24f   :  { %773 = vst [vmem:[#allocation8] sm:$0xff] %v943_v22 }
 0x250   :  { %1021 = shalt.err (!%p1018_p0)
}
 0x251   :  { %s1022_s24 = scalar_lea.hbm %s1210_s7, 128 }
 0x252   :  { %p1023_p1 = scmp.ne.s32.totalorder %s1210_s7, %s1022_s24  ;;  %p1026_p2 = scmp.lt.u32.totalorder %s1022_s24, %s1210_s7 }
 0x254   :  { %p1028_p3 = pnand %p1026_p2, %p1023_p1 }
 0x256   :  { %1031 = shalt.err (!%p1028_p3)
}
 0x257   :  { %783 = dma.vmem_to_hbm [thread:$0]  %s781_s21, 128, %s1210_s7, [#allocation4]  }
 0x258   :  { %1036 = dma.done.wait [#allocation4], 128  }
 0x259   :  { %1037 = vsyncadd [#allocation4], 4294967168 }
 0x25a   :  { %787 = vsyncpa [#allocation3], 1 }
 0x25b   :  { %788 = vsyncpa [#allocation6], 1 }
 0x25c   :  { %789 = vsyncpa [#allocation4], 1 }

</bundles_post_ra>
